<compile_context>
chip_gen: v7x
topology: tpu7x:2x2x1
jax: 0.10.0
libtpu: 0.0.40
codegen_flags: <defaults>
</compile_context>

<pallas_src>
import jax
import jax.numpy as jnp
from jax.experimental import pallas as pl
from jax.experimental.pallas import tpu as pltpu

EMBED_SIZE = 384
FF_HIDDEN_DIM = 64


def ffn_kernel(x_ref, w1_ref, b1_ref, w2_ref, b2_ref, o_ref):
    # x_ref: (TM, E) bf16, w1_ref: (E, H) bf16, b1_ref: (1, H) f32,
    # w2_ref: (H, E) bf16, b2_ref: (1, E) f32, o_ref: (TM, E) f32
    h = jnp.dot(x_ref[...], w1_ref[...], preferred_element_type=jnp.float32)
    h = jnp.maximum(h + b1_ref[...], 0.0)                       # ReLU, f32
    y = jnp.dot(h.astype(w2_ref.dtype), w2_ref[...],
                preferred_element_type=jnp.float32)
    o_ref[...] = (y + b2_ref[...]).astype(o_ref.dtype)


def _round_up(n, m):
    return ((n + m - 1) // m) * m


def feed_forward(x, w1, b1, w2, b2, *, tm=512):
    """x: (B, S, E) float32. Returns (B, S, E) float32."""
    B, S, E = x.shape
    hid = w1.shape[1]
    M = B * S

    # Large row tile to amortize per-grid-step overhead and fill the MXU on M;
    # clamp to the (16-aligned) padded row count so tiny inputs don't over-pad.
    tm_eff = min(tm, _round_up(M, 16))
    M_pad = _round_up(M, tm_eff)
    grid_m = M_pad // tm_eff

    # bf16 activations/weights; biases + accumulation stay f32.
    x2 = x.reshape(M, E).astype(jnp.bfloat16)
    if M_pad != M:
        x2 = jnp.pad(x2, ((0, M_pad - M), (0, 0)))
    w1b = w1.astype(jnp.bfloat16)
    w2b = w2.astype(jnp.bfloat16)
    b1f = b1.astype(jnp.float32)
    b2f = b2.astype(jnp.float32)

    flops = 2 * M_pad * E * hid * 2  # two GEMMs
    bytes_accessed = (x2.size * 2 + w1b.size * 2 + w2b.size * 2
                      + b1f.size * 4 + b2f.size * 4 + M_pad * E * 4)

    out = pl.pallas_call(
        ffn_kernel,
        out_shape=jax.ShapeDtypeStruct((M_pad, E), jnp.float32),
        grid_spec=pltpu.PrefetchScalarGridSpec(
            num_scalar_prefetch=0,
            grid=(grid_m,),
            in_specs=[
                pl.BlockSpec((tm_eff, E), lambda i: (i, 0)),   # x row tile
                pl.BlockSpec((E, hid), lambda i: (0, 0)),      # W1 (resident)
                pl.BlockSpec((1, hid), lambda i: (0, 0)),      # b1 (resident)
                pl.BlockSpec((hid, E), lambda i: (0, 0)),      # W2 (resident)
                pl.BlockSpec((1, E), lambda i: (0, 0)),        # b2 (resident)
            ],
            out_specs=pl.BlockSpec((tm_eff, E), lambda i: (i, 0)),
        ),
        compiler_params=pltpu.CompilerParams(
            dimension_semantics=("parallel",)),
        cost_estimate=pl.CostEstimate(
            flops=flops, transcendentals=0, bytes_accessed=bytes_accessed),
    )(x2, w1b, b1f, w2b, b2f)

    # Drop padded tail rows; they were never part of the real input.
    return out[:M].reshape(B, S, E)


def init_params(key, embed_size, ff_hidden_dim):
    # Mimic torch.nn.Linear default init: U(-1/sqrt(fan_in), 1/sqrt(fan_in)).
    k1, k2, k3, k4 = jax.random.split(key, 4)
    bound1 = 1.0 / (embed_size ** 0.5)
    bound2 = 1.0 / (ff_hidden_dim ** 0.5)
    # Stored as (in, out) so the kernel computes x @ W + b (== x @ W_torch.T + b).
    w1 = jax.random.uniform(k1, (embed_size, ff_hidden_dim), jnp.float32,
                            -bound1, bound1)
    b1 = jax.random.uniform(k2, (1, ff_hidden_dim), jnp.float32, -bound1, bound1)
    w2 = jax.random.uniform(k3, (ff_hidden_dim, embed_size), jnp.float32,
                            -bound2, bound2)
    b2 = jax.random.uniform(k4, (1, embed_size), jnp.float32, -bound2, bound2)
    return w1, b1, w2, b2


if __name__ == "__main__":
    key = jax.random.PRNGKey(0)
    kx, kp = jax.random.split(key)

    B, S = 2, 8  # small batch / sequence length
    x = jax.random.normal(kx, (B, S, EMBED_SIZE), jnp.float32)
    w1, b1, w2, b2 = init_params(kp, EMBED_SIZE, FF_HIDDEN_DIM)

    y = feed_forward(x, w1, b1, w2, b2)
    y = jax.block_until_ready(y)

    # Reference in plain JAX (f32). Tolerance loosened for bf16 inputs with
    # f32 accumulation.
    ref = jnp.maximum(x.reshape(-1, EMBED_SIZE) @ w1 + b1, 0.0) @ w2 + b2
    ref = ref.reshape(B, S, EMBED_SIZE)
    assert y.shape == (B, S, EMBED_SIZE)
    assert jnp.allclose(y, ref, atol=3e-2, rtol=3e-2), (
        float(jnp.max(jnp.abs(y - ref))))

    print("KERNEL_OK")
</pallas_src>

<mosaic_0001>
module attributes {stable_mosaic.version = 11 : i64} {
  func.func @ffn_kernel(%arg0: i32, %arg1: memref<16x384xbf16, #tpu.memory_space<vmem>>, %arg2: memref<384x64xbf16, #tpu.memory_space<vmem>>, %arg3: memref<1x64xf32, #tpu.memory_space<vmem>>, %arg4: memref<64x384xbf16, #tpu.memory_space<vmem>>, %arg5: memref<1x384xf32, #tpu.memory_space<vmem>>, %arg6: memref<16x384xf32, #tpu.memory_space<vmem>>) attributes {dimension_semantics = [#tpu.dimension_semantics<parallel>], iteration_bounds = array<i64: 1>, scalar_prefetch = 0 : i64, scratch_operands = 0 : i64, tpu.core_type = #tpu.core_type<tc>, window_params = [{transform_indices = @transform_0, window_bounds = array<i64: 16, 384>}, {pipeline_mode = #tpu.pipeline_mode<synchronous>, transform_indices = @transform_1, window_bounds = array<i64: 384, 64>}, {pipeline_mode = #tpu.pipeline_mode<synchronous>, transform_indices = @transform_2, window_bounds = array<i64: 1, 64>}, {pipeline_mode = #tpu.pipeline_mode<synchronous>, transform_indices = @transform_3, window_bounds = array<i64: 64, 384>}, {pipeline_mode = #tpu.pipeline_mode<synchronous>, transform_indices = @transform_4, window_bounds = array<i64: 1, 384>}, {transform_indices = @transform_5, window_bounds = array<i64: 16, 384>}]} {
    %c0 = arith.constant 0 : index
    %c0_0 = arith.constant 0 : index
    %0 = vector.load %arg1[%c0, %c0_0] : memref<16x384xbf16, #tpu.memory_space<vmem>>, vector<16x384xbf16>
    %c0_1 = arith.constant 0 : index
    %c0_2 = arith.constant 0 : index
    %1 = vector.load %arg2[%c0_1, %c0_2] : memref<384x64xbf16, #tpu.memory_space<vmem>>, vector<384x64xbf16>
    %cst = arith.constant dense<0.000000e+00> : vector<16x64xf32>
    %2 = tpu.matmul %0, %1, %cst {dimension_numbers = #tpu.dot_dimension_numbers<[1], [0], [0], [1], [0, 0, 1, 1], [], []>} : vector<16x384xbf16>, vector<384x64xbf16>, vector<16x64xf32> -> vector<16x64xf32>
    %c0_3 = arith.constant 0 : index
    %c0_4 = arith.constant 0 : index
    %3 = vector.load %arg3[%c0_3, %c0_4] : memref<1x64xf32, #tpu.memory_space<vmem>>, vector<1x64xf32>
    %4 = vector.broadcast %3 : vector<1x64xf32> to vector<16x64xf32>
    %5 = arith.addf %2, %4 : vector<16x64xf32>
    %cst_5 = arith.constant 0.000000e+00 : f32
    %6 = vector.broadcast %cst_5 : f32 to vector<16x64xf32>
    %7 = arith.maximumf %5, %6 : vector<16x64xf32>
    %8 = arith.truncf %7 : vector<16x64xf32> to vector<16x64xbf16>
    %c0_6 = arith.constant 0 : index
    %c0_7 = arith.constant 0 : index
    %9 = vector.load %arg4[%c0_6, %c0_7] : memref<64x384xbf16, #tpu.memory_space<vmem>>, vector<64x384xbf16>
    %cst_8 = arith.constant dense<0.000000e+00> : vector<16x384xf32>
    %10 = tpu.matmul %8, %9, %cst_8 {dimension_numbers = #tpu.dot_dimension_numbers<[1], [0], [0], [1], [0, 0, 1, 1], [], []>} : vector<16x64xbf16>, vector<64x384xbf16>, vector<16x384xf32> -> vector<16x384xf32>
    %c0_9 = arith.constant 0 : index
    %c0_10 = arith.constant 0 : index
    %11 = vector.load %arg5[%c0_9, %c0_10] : memref<1x384xf32, #tpu.memory_space<vmem>>, vector<1x384xf32>
    %12 = vector.broadcast %11 : vector<1x384xf32> to vector<16x384xf32>
    %13 = arith.addf %10, %12 : vector<16x384xf32>
    %c0_11 = arith.constant 0 : index
    %c0_12 = arith.constant 0 : index
    %14 = vector.load %arg6[%c0_11, %c0_12] : memref<16x384xf32, #tpu.memory_space<vmem>>, vector<16x384xf32>
    tpu.vector_store %arg6[%c0_11, %c0_12], %13 {strides = array<i32>} : memref<16x384xf32, #tpu.memory_space<vmem>>, vector<16x384xf32>,
    return
  }
  func.func @transform_0(%arg0: i32) -> (i32, i32) {
    %c0_i32 = arith.constant 0 : i32
    %c0_i32_0 = arith.constant 0 : i32
    return %arg0, %c0_i32 : i32, i32
  }
  func.func @transform_1(%arg0: i32) -> (i32, i32) {
    %c0_i32 = arith.constant 0 : i32
    %c0_i32_0 = arith.constant 0 : i32
    %c0_i32_1 = arith.constant 0 : i32
    return %c0_i32, %c0_i32_0 : i32, i32
  }
  func.func @transform_2(%arg0: i32) -> (i32, i32) {
    %c0_i32 = arith.constant 0 : i32
    %c0_i32_0 = arith.constant 0 : i32
    %c0_i32_1 = arith.constant 0 : i32
    return %c0_i32, %c0_i32_0 : i32, i32
  }
  func.func @transform_3(%arg0: i32) -> (i32, i32) {
    %c0_i32 = arith.constant 0 : i32
    %c0_i32_0 = arith.constant 0 : i32
    %c0_i32_1 = arith.constant 0 : i32
    return %c0_i32, %c0_i32_0 : i32, i32
  }
  func.func @transform_4(%arg0: i32) -> (i32, i32) {
    %c0_i32 = arith.constant 0 : i32
    %c0_i32_0 = arith.constant 0 : i32
    %c0_i32_1 = arith.constant 0 : i32
    return %c0_i32, %c0_i32_0 : i32, i32
  }
  func.func @transform_5(%arg0: i32) -> (i32, i32) {
    %c0_i32 = arith.constant 0 : i32
    %c0_i32_0 = arith.constant 0 : i32
    return %arg0, %c0_i32 : i32, i32
  }
}

</mosaic_0001>

<bundles_post_ra>
// kernel: tpu_custom_call.1
= control target key start
LH: loop header
LB: loop body
LE: loop exit
PB: predicated region body
PF: predicated region fallthrough
CT: control target
= control target key end

     0   :  { %v717_v2 = vmov 0.0   ;;  %vm718_vm0 = vmmov 0   ;;  %s904_s0 = inlined_call_operand.vmem [shape: bf16[16,384], index: 0, kind: input, shape index: {}]   ;;  %s905_s1 = inlined_call_operand.vmem [shape: bf16[384,64], index: 1, kind: input, shape index: {}]   ;;  %s906_s2 = inlined_call_operand.vmem [shape: f32[1,64], index: 2, kind: input, shape index: {}]   ;;  %s907_s3 = inlined_call_operand.vmem [shape: bf16[64,384], index: 3, kind: input, shape index: {}]   ;;  %s908_s4 = inlined_call_operand.vmem [shape: f32[1,384], index: 4, kind: input, shape index: {}]   ;;  %s909_s5 = inlined_call_operand.hbm [shape: f32[16,384], index: 5, kind: output, shape index: {}]  }
   0x1   :  { %v649_v0 = vld [vmem:[%s905_s1 + $0x40] sm:$0xff]   ;;  %611 = vmatprep.subr.bf16.mxu1 %v717_v2  ;;  %627 = vmatprep.mubr.msk.bf16.mxu1 %vm718_vm0, %v717_v2  ;;  %v652_v4 = vld [vmem:[%s905_s1 + $0x48] sm:$0xff]   ;;  %v655_v7 = vld [vmem:[%s905_s1 + $0x50] sm:$0xff]  }
   0x2   :  { %v650_v1 = vld [vmem:[%s905_s1] sm:$0xff]   ;;  %575 = vmatprep.subr.bf16.mxu0 %v649_v0  ;;  %v653_v5 = vld [vmem:[%s905_s1 + $0x8] sm:$0xff]   ;;  %v656_v8 = vld [vmem:[%s905_s1 + $0x10] sm:$0xff]  }
   0x3   :  { %v651_v3 = vld [vmem:[%s905_s1 + $0x80] sm:$0xff]   ;;  %576 = vmatpush3.bf16.msra.mxu0 %v650_v1  ;;  %v654_v6 = vld [vmem:[%s905_s1 + $0x88] sm:$0xff]   ;;  %v657_v9 = vld [vmem:[%s905_s1 + $0x90] sm:$0xff]  }
   0x4   :  { %612 = vmatpush3.bf16.msra.mxu1 %v651_v3  ;;  %577 = vmatprep.subr.bf16.mxu0 %v652_v4  ;;  %v658_v10 = vld [vmem:[%s905_s1 + $0x58] sm:$0xff]   ;;  %v661_v13 = vld [vmem:[%s905_s1 + $0x60] sm:$0xff]   ;;  %v664_v16 = vld [vmem:[%s905_s1 + $0x68] sm:$0xff]  }
   0x5   :  { %613 = vmatprep.subr.bf16.mxu1 %v717_v2  ;;  %v659_v11 = vld [vmem:[%s905_s1 + $0x18] sm:$0xff]   ;;  %v662_v14 = vld [vmem:[%s905_s1 + $0x20] sm:$0xff]   ;;  %v665_v17 = vld [vmem:[%s905_s1 + $0x28] sm:$0xff]  }
   0x6   :  { %v660_v12 = vld [vmem:[%s905_s1 + $0x98] sm:$0xff]   ;;  %v663_v15 = vld [vmem:[%s905_s1 + $0xa0] sm:$0xff]   ;;  %v666_v18 = vld [vmem:[%s905_s1 + $0xa8] sm:$0xff]  }
   0x7   :  { %578 = vmatpush3.bf16.msra.mxu0 %v653_v5  ;;  %v667_v19 = vld [vmem:[%s905_s1 + $0x70] sm:$0xff]   ;;  %v670_v22 = vld [vmem:[%s905_s1 + $0x78] sm:$0xff]   ;;  %v672_v26 = vld [vmem:[%s904_s0] ss:$12 sps:$4 sm:$0xff]  }
   0x8   :  { %614 = vmatpush3.bf16.msra.mxu1 %v654_v6  ;;  %579 = vmatprep.subr.bf16.mxu0 %v655_v7  ;;  %v668_v20 = vld [vmem:[%s905_s1 + $0x30] sm:$0xff]   ;;  %v671_v24 = vld [vmem:[%s905_s1 + $0x38] sm:$0xff]   ;;  %v677_v29 = vld [vmem:[%s907_s3] ss:$12 sps:$4 sm:$0xff]  }
   0x9   :  { %615 = vmatprep.subr.bf16.mxu1 %v717_v2  ;;  %v669_v21 = vld [vmem:[%s905_s1 + $0xb0] sm:$0xff]   ;;  %v675_v25 = vld [vmem:[%s905_s1 + $0xb8] sm:$0xff]  }
   0xa   :  { %v674_v23 = vld [vmem:[%s904_s0 + $0x4] ss:$12 sps:$4 sm:$0xff]   ;;  %v676_v28 = vld [vmem:[%s904_s0 + $0x8] ss:$12 sps:$4 sm:$0xff]  }
   0xb   :  { %580 = vmatpush3.bf16.msra.mxu0 %v656_v8  ;;  %273 = vmatprep.mubr.bf16.mxu0 %v674_v23  ;;  %v679_v27 = vld [vmem:[%s907_s3 + $0x4] ss:$12 sps:$4 sm:$0xff]   ;;  %v680_v30 = vld [vmem:[%s907_s3 + $0x8] ss:$12 sps:$4 sm:$0xff]  }
   0xc   :  { %616 = vmatpush3.bf16.msra.mxu1 %v657_v9  ;;  %581 = vmatprep.subr.bf16.mxu0 %v658_v10 }
   0xd   :  { %617 = vmatprep.subr.bf16.mxu1 %v717_v2 }
   0xf   :  { %582 = vmatpush3.bf16.msra.mxu0 %v659_v11 }
  0x10   :  { %618 = vmatpush3.bf16.msra.mxu1 %v660_v12  ;;  %583 = vmatprep.subr.bf16.mxu0 %v661_v13 }
  0x11   :  { %619 = vmatprep.subr.bf16.mxu1 %v717_v2 }
  0x13   :  { %584 = vmatpush3.bf16.msra.mxu0 %v662_v14 }
  0x14   :  { %620 = vmatpush3.bf16.msra.mxu1 %v663_v15  ;;  %585 = vmatprep.subr.bf16.mxu0 %v664_v16 }
  0x15   :  { %621 = vmatprep.subr.bf16.mxu1 %v717_v2 }
  0x17   :  { %586 = vmatpush3.bf16.msra.mxu0 %v665_v17 }
  0x18   :  { %622 = vmatpush3.bf16.msra.mxu1 %v666_v18  ;;  %587 = vmatprep.subr.bf16.mxu0 %v667_v19 }
  0x19   :  { %623 = vmatprep.subr.bf16.mxu1 %v717_v2 }
  0x1b   :  { %588 = vmatpush3.bf16.msra.mxu0 %v668_v20 }
  0x1c   :  { %624 = vmatpush3.bf16.msra.mxu1 %v669_v21  ;;  %589 = vmatprep.subr.bf16.mxu0 %v670_v22 }
  0x1d   :  { %625 = vmatprep.subr.bf16.mxu1 %v717_v2 }
  0x1f   :  { %590 = vmatpush3.bf16.msra.mxu0 %v671_v24 }
  0x20   :  { %626 = vmatpush3.bf16.msra.mxu1 %v675_v25  ;;  %427 = vmatprep.subr.bf16.mxu0 %v679_v27 }
  0x21   :  { %10 = vsyncpa [#allocation3], 0  ;;  %631 = vmatprep.subr.bf16.mxu1 %v717_v2  ;;  %v683_v31 = vld [vmem:[%s907_s3 + $0x1c] ss:$12 sps:$4 sm:$0xff]   ;;  %v681_v32 = vld [vmem:[%s907_s3 + $0x18] ss:$12 sps:$4 sm:$0xff]   ;;  %v344_v59 = vlaneseq }
  0x22   :  { %274 = vmatmul.mubr.bf16.vlgmr.msra.gmra.mrb[0].mxu0 %v672_v26  ;;  %v684_v33 = vld [vmem:[%s907_s3 + $0x20] ss:$12 sps:$4 sm:$0xff]   ;;  %v685_v35 = vld [vmem:[%s907_s3 + $0x30] ss:$12 sps:$4 sm:$0xff]   ;;  %v688_v36 = vld [vmem:[%s907_s3 + $0x38] ss:$12 sps:$4 sm:$0xff]  }
  0x23   :  { %628 = vmatmul.mubr.bf16.vlgmr.msra.gmra.mrb[0].mxu1 %v676_v28  ;;  %428 = vmatpush1.bf16.msra.mxu0 %v677_v29  ;;  %v687_v34 = vld [vmem:[%s907_s3 + $0x34] ss:$12 sps:$4 sm:$0xff]   ;;  %v691_v37 = vld [vmem:[%s907_s3 + $0x4c] ss:$12 sps:$4 sm:$0xff]   ;;  %v692_v39 = vld [vmem:[%s907_s3 + $0x50] ss:$12 sps:$4 sm:$0xff]  }
  0x24   :  { %632 = vmatpush3.bf16.msra.mxu1 %v680_v30  ;;  %639 = vmatprep.mubr.msk.bf16.mxu1 %vm718_vm0, %v717_v2  ;;  %v689_v38 = vld [vmem:[%s907_s3 + $0x48] ss:$12 sps:$4 sm:$0xff]   ;;  %v719_v40 = vmov 0   ;;  %v533_v43 = vld [vmem:[%s906_s2] ss:$0 sm:$0xff]  ;;  %vm423_vm1 = vcmask 523264  }
  0x25   :  { %633 = vmatprep.subr.bf16.mxu1 %v717_v2  ;;  %429 = vmatprep.subr.bf16.mxu0 %v683_v31  ;;  %v345_v60 = vshrl.u32 %v344_v59, 7  ;;  %v342_v63 = vld [vmem:[%s908_s4] sm:$0x7]  ;;  %s720_s21 = smov [#allocation2]  }
  0x26   :  { %459 = vmatprep.mubr.bf16.mxu0 %v719_v40  ;;  %s522_s22 = sshll.u32 %s720_s21, 4  ;;  %s523_s22 = int_to_ptr.vmem [resolvable:$true] %s522_s22 }
  0x27   :  { %430 = vmatpush1.bf16.msra.mxu0 %v681_v32  ;;  %v346_v61 = vsub.s32 0, %v345_v60  ;;  %v354_v62 = vsub.s32 2, %v345_v60  ;;  %v350_v0 = vsub.s32 1, %v345_v60  ;;  %s693_s4 = scalar_lea.vmem %s523_s22, 768  ;;  %p698_p1 = scmp.lt.s32.totalorder %s523_s22, %s523_s22 }
  0x28   :  { %634 = vmatpush3.bf16.msra.mxu1 %v684_v33  ;;  %431 = vmatprep.subr.bf16.mxu0 %v687_v34  ;;  %p694_p0 = scmp.ne.s32.totalorder %s523_s22, %s693_s4  ;;  %p699_p2 = scmp.lt.s32.totalorder %s693_s4, %s693_s4 }
  0x29   :  { %635 = vmatprep.subr.bf16.mxu1 %v717_v2  ;;  %v347_v1 = vrot.slane %v342_v63, %v346_v61  ;;  %v351_v3 = vrot.slane %v342_v63, %v350_v0 }
  0x2a   :  { %p700_p3 = por %p699_p2, %p698_p1 }
  0x2b   :  { %432 = vmatpush1.bf16.msra.mxu0 %v685_v35 }
  0x2c   :  { %636 = vmatpush3.bf16.msra.mxu1 %v688_v36  ;;  %433 = vmatprep.subr.bf16.mxu0 %v691_v37  ;;  %p701_p4 = pnand %p700_p3, %p694_p0 }
  0x2d   :  { %637 = vmatprep.subr.bf16.mxu1 %v717_v2  ;;  %v355_v2 = vrot.slane %v342_v63, %v354_v62 }
  0x2f   :  { %434 = vmatpush1.bf16.msra.mxu0 %v689_v38 }
  0x30   :  { %638 = vmatpush3.bf16.msra.mxu1 %v692_v39 }
  0xf5   :  { %v591_v41 = vpop.f32.mrb[0].mxu0 }
  0xf6   :  { %v592_v42 = vpop.f32.mrb[1].mxu0  ;;  %v316_v44 = vpop.f32.mrb[0].mxu1 }
  0xf7   :  { %v593_v45 = vadd.f32 %v592_v42, %v591_v41  ;;  %v594_v46 = vpop.f32.mrb[2].mxu0  ;;  %v629_v47 = vpop.f32.mrb[1].mxu1 }
  0xf8   :  { %v595_v48 = vpop.f32.mrb[3].mxu0  ;;  %v319_v49 = vpop.f32.mrb[2].mxu1 }
  0xf9   :  { %v276_v50 = vadd.f32 %v593_v45, %v533_v43  ;;  %v596_v51 = vadd.f32 %v595_v48, %v594_v46  ;;  %v630_v52 = vpop.f32.mrb[3].mxu1 }
  0xfb   :  { %v317_v53 = vadd.f32 %v316_v44, %v276_v50  ;;  %v279_v54 = vadd.f32 %v596_v51, %v533_v43 }
  0xfd   :  { %v320_v55 = vadd.f32 %v319_v49, %v279_v54  ;;  %v323_v56 = vmax.f32 %v317_v53, 0.0 }
  0xff   :  { %v324_v57 = vmax.f32 %v320_v55, 0.0 }
 0x101   :  { %v325_v58 = vpack.c.bf16 %v324_v57, %v323_v56 }
 0x103   :  { %573 = vmatmul.mubr.msk.bf16.vlgmr.msra.gmra.mrb[4].mxu0 %vm423_vm1, %v325_v58  ;;  %640 = vmatmul.mubr.msk.bf16.vlgmr.msra.gmra.mrb[4].mxu1 %vm423_vm1, %v325_v58 }
 0x1d6   :  { %v461_v4 = vpop.f32.mrb[4].mxu0  ;;  %v504_v5 = vpop.f32.mrb[4].mxu1 }
 0x1d7   :  { %v462_v6 = vadd.f32 %v461_v4, %v347_v1  ;;  %v505_v7 = vadd.f32 %v504_v5, %v355_v2  ;;  %v463_v8 = vpop.f32.mrb[5].mxu0  ;;  %v641_v9 = vpop.f32.mrb[5].mxu1 }
 0x1d8   :  { %v464_v10 = vadd.f32 %v463_v8, %v351_v3  ;;  %v465_v11 = vpop.f32.mrb[6].mxu0  ;;  %v507_v12 = vpop.f32.mrb[6].mxu1 }
 0x1d9   :  { %511 = vst [vmem:[#allocation2] sm:$0xff] %v462_v6  ;;  %513 = vst [vmem:[#allocation2 + $0x10] sm:$0xff] %v505_v7  ;;  %v466_v13 = vadd.f32 %v465_v11, %v347_v1  ;;  %v508_v14 = vadd.f32 %v507_v12, %v355_v2  ;;  %v467_v15 = vpop.f32.mrb[7].mxu0  ;;  %v642_v16 = vpop.f32.mrb[7].mxu1 }
 0x1da   :  { %512 = vst [vmem:[#allocation2 + $0x8] sm:$0xff] %v464_v10  ;;  %v468_v17 = vadd.f32 %v467_v15, %v351_v3 }
 0x1db   :  { %514 = vst [vmem:[#allocation2 + $0x18] sm:$0xff] %v466_v13  ;;  %516 = vst [vmem:[#allocation2 + $0x28] sm:$0xff] %v508_v14 }
 0x1dc   :  { %515 = vst [vmem:[#allocation2 + $0x20] sm:$0xff] %v468_v17 }
 0x1dd   :  { %704 = shalt.err (!%p701_p4)
}
 0x1de   :  { %s705_s25 = scalar_lea.hbm %s909_s5, 768 }
 0x1df   :  { %p706_p5 = scmp.ne.s32.totalorder %s909_s5, %s705_s25  ;;  %p709_p6 = scmp.lt.u32.totalorder %s705_s25, %s909_s5 }
 0x1e1   :  { %p711_p7 = pnand %p709_p6, %p706_p5 }
 0x1e3   :  { %714 = shalt.err (!%p711_p7)
}
 0x1e4   :  { %s721_s28 = smov 384   ;;  %s722_s29 = smov 24  }
 0x1e5   :  { %528 = dma.vmem_to_hbm [thread:$0]  %s523_s22, 768, %s909_s5, [#allocation3], %s721_s28, %s721_s28, %s722_s29  }
 0x1e6   :  { %715 = dma.done.wait [#allocation3], 768  }
 0x1e7   :  { %716 = vsyncadd [#allocation3], 4294966528 }
 0x1e8   :  { %532 = vsyncpa [#allocation3], 1 }

</bundles_post_ra>
